<compile_context>
chip_gen: v7x
topology: tpu7x:2x2x1
jax: 0.10.0
libtpu: 0.0.40
codegen_flags: <defaults>
</compile_context>

<pallas_src>
import jax
import jax.numpy as jnp
from jax.experimental import pallas as pl
from jax.experimental.pallas import tpu as pltpu


def _round_up(x, m):
    return ((x + m - 1) // m) * m


def _round_down(x, m):
    return (x // m) * m


def _conv1x1_kernel(x_ref, w_ref, b_ref, o_ref):
    # x_ref: (C_in, tn)  VMEM tile (lane-dense load)
    # w_ref: (tm, C_in)  VMEM (resident across spatial steps)
    # b_ref: (tm, 1)     VMEM
    # o_ref: (tm, tn)    VMEM tile (single lane-dense store)
    acc = jnp.dot(w_ref[...], x_ref[...], preferred_element_type=jnp.float32)
    o_ref[...] = (acc + b_ref[...].astype(jnp.float32)).astype(o_ref.dtype)


def _vmem_capacity_bytes():
    try:
        return int(pltpu.get_tpu_info().vmem_capacity_bytes)
    except Exception:
        return 64 << 20  # conservative fallback (v7x per-TC VMEM)


def _pick_cout_tile(c_out):
    # Keep the full C_out resident when reasonable; otherwise tile in
    # MXU-friendly chunks (multiple of 8 sublanes, aligned to 256).
    return c_out if c_out <= 256 else 256


def _pick_spatial_tile(hw, n_batch, n_cout_blocks, c_in, tm, itemsize,
                       w_itemsize, vmem_capacity):
    """Spatial (lane) tile: multiple of 128, or the full H*W."""
    if hw <= 128:
        return hw
    # (a) VMEM cap: double-buffered x/out tiles must fit ~40% of this chip's
    #     VMEM after subtracting the double-buffered weight/bias block.
    budget = int(0.4 * vmem_capacity) - 2 * (tm * c_in + tm) * w_itemsize
    per_col = 2 * (c_in + tm) * itemsize
    cap_vmem = max(128, _round_down(max(budget, 0) // max(per_col, 1), 128))
    # (b) Moderate per-block size (~4 MiB of x): past ~1K lanes the kernel is
    #     already at the HBM roofline; huge tiles only expose prologue DMA.
    cap_moderate = max(128, _round_down((4 << 20) // max(c_in * itemsize, 1), 128))
    # (c) Enough grid blocks for megacore sharding + pipelining (aim >= ~8).
    per_image_target = max(2, -(-8 // max(n_batch * n_cout_blocks, 1)))
    cap_blocks = max(128, _round_up(-(-hw // per_image_target), 128))
    tn = min(cap_vmem, cap_moderate, cap_blocks)
    return hw if tn >= hw else tn


def output_convolution(x_nchw, weight, bias):
    """1x1 conv with bias (== nn.Conv2d(in_ch, out_ch, 1) forward).

    x_nchw: (N, C_in, H, W); weight: (C_out, C_in) or (C_out, C_in, 1, 1);
    bias: (C_out,).  Returns (N, C_out, H, W) in x's dtype.
    """
    N, C_in, H, W = x_nchw.shape
    weight = weight.reshape(weight.shape[0], C_in).astype(x_nchw.dtype)
    C_out = weight.shape[0]
    bias = bias.reshape(C_out, 1).astype(x_nchw.dtype)
    HW = H * W

    # Free reshape (no data movement): channels on sublanes, H*W on lanes.
    x = x_nchw.reshape(N, C_in, HW)

    itemsize = jnp.dtype(x.dtype).itemsize
    w_itemsize = jnp.dtype(weight.dtype).itemsize
    vmem_capacity = _vmem_capacity_bytes()

    tm = _pick_cout_tile(C_out)
    n_cout = pl.cdiv(C_out, tm)
    tn = _pick_spatial_tile(HW, N, n_cout, C_in, tm, itemsize, w_itemsize,
                            vmem_capacity)
    n_spatial = pl.cdiv(HW, tn)  # partial tail block handled by Pallas

    # VMEM limit: double-buffered x/out tiles + double-buffered weight/bias
    # blocks + slack, clamped to 75% of this generation's physical VMEM.
    needed = (2 * (C_in + tm) * tn * itemsize
              + 2 * (tm * C_in + tm) * w_itemsize
              + (2 << 20))
    vmem_limit = int(min(max(needed, 16 << 20), int(0.75 * vmem_capacity)))

    out = pl.pallas_call(
        _conv1x1_kernel,
        out_shape=jax.ShapeDtypeStruct((N, C_out, HW), x.dtype),
        grid_spec=pltpu.PrefetchScalarGridSpec(
            num_scalar_prefetch=0,
            grid=(N, n_cout, n_spatial),
            in_specs=[
                pl.BlockSpec((None, C_in, tn), lambda n, m, j: (n, 0, j)),
                pl.BlockSpec((tm, C_in), lambda n, m, j: (m, 0)),
                pl.BlockSpec((tm, 1), lambda n, m, j: (m, 0)),
            ],
            out_specs=pl.BlockSpec((None, tm, tn), lambda n, m, j: (n, m, j)),
        ),
        compiler_params=pltpu.CompilerParams(
            dimension_semantics=("parallel", "parallel", "parallel"),
            vmem_limit_bytes=vmem_limit,
        ),
    )(x, weight, bias)

    return out.reshape(N, C_out, H, W)


if __name__ == "__main__":
    # Shapes implied by the module: NCHW input, 1x1 conv in_ch -> out_ch.
    N, C_in, H, W = 2, 4, 16, 16
    C_out = 3

    key = jax.random.PRNGKey(0)
    kx, kw, kb = jax.random.split(key, 3)

    x = jax.random.normal(kx, (N, C_in, H, W), dtype=jnp.float32)
    # Deterministic parameter init (PyTorch weight shape (C_out, C_in, 1, 1) squeezed).
    bound = 1.0 / (C_in ** 0.5)
    weight = jax.random.uniform(kw, (C_out, C_in), minval=-bound, maxval=bound,
                                dtype=jnp.float32)
    bias = jax.random.uniform(kb, (C_out,), minval=-bound, maxval=bound,
                              dtype=jnp.float32)

    out = output_convolution(x, weight, bias)
    out = jax.block_until_ready(out)

    # Reference check in plain JAX (same math as nn.Conv2d with 1x1 kernel).
    ref = jnp.einsum("nchw,oc->nohw", x, weight) + bias[None, :, None, None]
    assert out.shape == (N, C_out, H, W)
    assert jnp.allclose(out, ref, atol=1e-5, rtol=1e-5), "mismatch vs reference"

    print("KERNEL_OK")
</pallas_src>

<mosaic_0001>
module attributes {stable_mosaic.version = 11 : i64} {
  func.func @_conv1x1_kernel(%arg0: i32, %arg1: i32, %arg2: i32, %arg3: memref<1x4x128xf32, #tpu.memory_space<vmem>>, %arg4: memref<3x4xf32, #tpu.memory_space<vmem>>, %arg5: memref<3x1xf32, #tpu.memory_space<vmem>>, %arg6: memref<1x3x128xf32, #tpu.memory_space<vmem>>) attributes {dimension_semantics = [#tpu.dimension_semantics<parallel>, #tpu.dimension_semantics<parallel>, #tpu.dimension_semantics<parallel>], iteration_bounds = array<i64: 2, 1, 2>, scalar_prefetch = 0 : i64, scratch_operands = 0 : i64, tpu.core_type = #tpu.core_type<tc>, window_params = [{transform_indices = @transform_0, window_bounds = array<i64: 1, 4, 128>}, {transform_indices = @transform_1, window_bounds = array<i64: 3, 4>}, {transform_indices = @transform_2, window_bounds = array<i64: 3, 1>}, {transform_indices = @transform_3, window_bounds = array<i64: 1, 3, 128>}]} {
    %c0 = arith.constant 0 : index
    %c0_0 = arith.constant 0 : index
    %0 = vector.load %arg4[%c0, %c0_0] : memref<3x4xf32, #tpu.memory_space<vmem>>, vector<3x4xf32>
    %c0_1 = arith.constant 0 : index
    %c0_2 = arith.constant 0 : index
    %c0_3 = arith.constant 0 : index
    %1 = vector.load %arg3[%c0_1, %c0_2, %c0_3] : memref<1x4x128xf32, #tpu.memory_space<vmem>>, vector<1x4x128xf32>
    %2 = vector.shape_cast %1 : vector<1x4x128xf32> to vector<4x128xf32>
    %cst = arith.constant dense<0.000000e+00> : vector<3x128xf32>
    %3 = tpu.matmul %0, %2, %cst {dimension_numbers = #tpu.dot_dimension_numbers<[1], [0], [0], [1], [0, 0, 1, 1], [], []>} : vector<3x4xf32>, vector<4x128xf32>, vector<3x128xf32> -> vector<3x128xf32>
    %c0_4 = arith.constant 0 : index
    %c0_5 = arith.constant 0 : index
    %4 = vector.load %arg5[%c0_4, %c0_5] : memref<3x1xf32, #tpu.memory_space<vmem>>, vector<3x1xf32>
    %5 = vector.broadcast %4 : vector<3x1xf32> to vector<3x128xf32>
    %6 = arith.addf %3, %5 : vector<3x128xf32>
    %c0_6 = arith.constant 0 : index
    %c0_7 = arith.constant 0 : index
    %c0_8 = arith.constant 0 : index
    %7 = vector.load %arg6[%c0_6, %c0_7, %c0_8] : memref<1x3x128xf32, #tpu.memory_space<vmem>>, vector<1x3x128xf32>
    %8 = vector.shape_cast %7 : vector<1x3x128xf32> to vector<3x128xf32>
    %9 = vector.shape_cast %6 : vector<3x128xf32> to vector<1x3x128xf32>
    tpu.vector_store %arg6[%c0_6, %c0_7, %c0_8], %9 {strides = array<i32>} : memref<1x3x128xf32, #tpu.memory_space<vmem>>, vector<1x3x128xf32>,
    return
  }
  func.func @transform_0(%arg0: i32, %arg1: i32, %arg2: i32) -> (i32, i32, i32) {
    %c0_i32 = arith.constant 0 : i32
    %c0_i32_0 = arith.constant 0 : i32
    return %arg0, %c0_i32, %arg2 : i32, i32, i32
  }
  func.func @transform_1(%arg0: i32, %arg1: i32, %arg2: i32) -> (i32, i32) {
    %c0_i32 = arith.constant 0 : i32
    %c0_i32_0 = arith.constant 0 : i32
    return %arg1, %c0_i32 : i32, i32
  }
  func.func @transform_2(%arg0: i32, %arg1: i32, %arg2: i32) -> (i32, i32) {
    %c0_i32 = arith.constant 0 : i32
    %c0_i32_0 = arith.constant 0 : i32
    return %arg1, %c0_i32 : i32, i32
  }
  func.func @transform_3(%arg0: i32, %arg1: i32, %arg2: i32) -> (i32, i32, i32) {
    %c0_i32 = arith.constant 0 : i32
    return %arg0, %arg1, %arg2 : i32, i32, i32
  }
}

</mosaic_0001>

<bundles_post_ra>
// kernel: tpu_custom_call.1
= control target key start
LH: loop header
LB: loop body
LE: loop exit
PB: predicated region body
PF: predicated region fallthrough
CT: control target
= control target key end

     0   :  { %8 = vsyncpa [#allocation3], 0  ;;  %s872_s0 = inlined_call_operand.hbm [shape: f32[2,4,256], index: 0, kind: input, shape index: {}]   ;;  %s873_s1 = inlined_call_operand.vmem [shape: f32[3,4], index: 1, kind: input, shape index: {}]   ;;  %s874_s2 = inlined_call_operand.vmem [shape: f32[3,1], index: 2, kind: input, shape index: {}]   ;;  %s875_s3 = inlined_call_operand.vmem [shape: f32[2,3,256], index: 3, kind: output, shape index: {}]  }
   0x1   :  { %10 = vsyncpa [#allocation3 + $0x1], 0  ;;  %s714_s12 = smov 0   ;;  %s716_s13 = smov 0  }
   0x2   :  { %s718_s14 = smov 0   ;;  %s720_s15 = smov 0  }
   0x3   :  { %s722_s16 = smov 0   ;;  %s724_s17 = smov 0  }
   0x4   :  { %s726_s18 = smov 0   ;;  %s728_s19 = smov 0  }
   0x5 LB: > { %s493_s20 = sadd.s32 4294967295, %s688_s19   ;;  %s28_s21 = sadd.s32 1, %s680_s17  ;;  %s688_s19 = sphi %s728_s19, %s16_s19   ;;  %s684_s18 = sphi %s726_s18, %s887_s18   ;;  %s680_s17 = sphi %s724_s17, %s886_s17   ;;  %s676_s16 = sphi %s722_s16, %s885_s16   ;;  %s672_s15 = sphi %s720_s15, %s884_s15   ;;  %s668_s14 = sphi %s718_s14, %s883_s14   ;;  %s664_s13 = sphi %s716_s13, %s882_s13   ;;  %s660_s12 = sphi %s714_s12, %s881_s12  }
   0x6   : > { %p29_p0 = scmp.ge.s32.totalorder %s28_s21, 2  ;;  %s35_s22 = sadd.s32 1, %s684_s18 }
   0x7   : > { %s44_s23 = sadd.s32 1, %s668_s14  ;;  %p51_p1 = scmp.ne.s32.totalorder %s668_s14, %s664_s13 }
   0x8   : > { %s889_s21 = smov (%p29_p0, %s28_s21), 0  ;;  %s891_s22 = smov (!%p29_p0, %s35_s22), %s684_s18 }
   0x9   : > { %s40_s24 = ssub.s32 %s680_s17, %s889_s21  ;;  %p52_p2 = scmp.eq.s32.totalorder %s688_s19, 0 }
   0xa   : > { %p37_p3 = scmp.ge.s32.totalorder %s891_s22, 2  ;;  %p57_p4 = scmp.ne.s32.totalorder %s664_s13, %s660_s12 }
   0xb   : > { %p765_p5 = por %p52_p2, %p51_p1  ;;  %p58_p6 = scmp.eq.s32.totalorder %s493_s20, 0 }
   0xc   : > { %s893_s22 = smov (%p37_p3, %s891_s22), 0  ;;  %p523_p8 = scmp.lt.s32.totalorder %s688_s19, 4 }
   0xd   : > { %p771_p7 = por %p58_p6, %p57_p4  ;;  %s39_s27 = ssub.s32 %s684_s18, %s893_s22 }
   0xe   : > { %s41_s28 = sor.u32 %s40_s24, %s39_s27  ;;  %s177_s29 = sand.u32 1, %s668_s14  }
   0xf   : > { %p42_p9 = scmp.eq.s32.totalorder %s41_s28, 0  ;;  %s499_s30 = sshll.u32 %s177_s29, 2 }
  0x10   : > { %s500_s4 = sshll.u32 %s684_s18, 1  ;;  %s181_s8 = scalar_lea.vmem [#allocation2], %s499_s30 }
  0x11   : > { %s781_s5 = scalar_select %p42_p9, %s668_s14, %s44_s23  }
  0x12   : > { %s186_s6 = sadd.s32 %s680_s17, %s500_s4  ;;  %s190_s9 = sshll.u32 %s181_s8, 4  ;;  %s789_s9 = int_to_ptr.vmem [resolvable:$true] %s190_s9 }
  0x13   : > { %s501_s7 = sshll.u32 %s186_s6, 6  ;;  %p795_p10 = pnand %p523_p8, %p765_p5 }
  0x14   : > { %s787_s12 = scalar_lea.hbm %s872_s0, %s501_s7  ;;  %s178_s23 = scalar_lea.sflag [#allocation3], %s177_s29 }
  0x15   : > { %s592_s24 = scalar_lea.hbm %s787_s12, 64  ;;  %p594_p0 = pneg %p795_p10 }
  0x16   : > { %p593_p13 = scmp.ne.s32.totalorder %s787_s12, %s592_s24  ;;  %s597_s28 = scalar_lea.hbm %s872_s0, 256 }
  0x17   : > { %p598_p3 = scmp.lt.u32.totalorder %s787_s12, %s872_s0  ;;  %p599_p4 = scmp.lt.u32.totalorder %s597_s28, %s592_s24 }
  0x18   : > { %p595_p1 = pnand %p594_p0, %p593_p13  ;;  %p601_p6 = scmp.lt.u32.totalorder %s592_s24, %s787_s12 }
  0x19   : > { %p600_p5 = por %p599_p4, %p598_p3 }
  0x1a   : > { %p596_p2 = pneg %p595_p1 }
  0x1b   : > { %p602_p8 = por %p601_p6, %p600_p5 }
  0x1d   : > { %p603_p9 = pnand %p602_p8, %p596_p2 }
  0x1f   : > { %606 = shalt.err (!%p603_p9)
}
  0x20   : > { %s607_s29 = scalar_lea.vmem %s789_s9, 64  ;;  %s690_s6 = smov [#allocation2]  }
  0x21   : > { %p608_p13 = scmp.ne.s32.totalorder %s789_s9, %s607_s29  ;;  %s612_s7 = sshll.u32 %s690_s6, 4  ;;  %s613_s7 = int_to_ptr.vmem [resolvable:$false] %s612_s7 }
  0x22   : > { %s614_s8 = scalar_lea.vmem %s613_s7, 128  ;;  %p615_p12 = scmp.lt.s32.totalorder %s789_s9, %s613_s7 }
  0x23   : > { %p610_p1 = pnand %p608_p13, %p594_p0  ;;  %p616_p3 = scmp.lt.s32.totalorder %s614_s8, %s607_s29 }
  0x25   : > { %p611_p11 = pneg %p610_p1  ;;  %p617_p4 = por %p616_p3, %p615_p12 }
  0x27   : > { %p618_p5 = pnand %p617_p4, %p611_p11 }
  0x29   : > { %621 = shalt.err (!%p618_p5)
}
  0x2a   : > { %522 = dma.hbm_to_vmem [thread:$0]  (!%p795_p10), %s787_s12, 64, %s789_s9, %s178_s23  }
  0x2b   : > { %p879_p2 = scmp.lt.s32.totalorder %s688_s19, 5  ;;  %p880_p6 = scmp.ge.s32.totalorder %s688_s19, 1 }
  0x2d   : > { %p196_p0 = pnand %p880_p6, %p879_p2 }
  0x2e   : > { %s201_s10 = sand.u32 (!%p196_p0), 1, %s664_s13  }
  0x2f   : > { %199 = sbr.rel (%p196_p0) target bundleno = 273 (0x111), region = 32  ;;  %s503_s11 = sshll.u32 (!%p196_p0), %s201_s10, 2 }
  0x30   : > { %s202_s24 = scalar_lea.sflag (!%p196_p0), [#allocation3], %s201_s10  ;;  %s205_s27 = scalar_lea.vmem (!%p196_p0), [#allocation2], %s503_s11 }
  0x36   : > { %655 = dma.done.wait (%p771_p7), %s202_s24, 64  }
  0x37   : > { %657 = vsyncadd (%p771_p7), %s202_s24, 4294967232  ;;  %v691_v0 = vmov 0.0   ;;  %vm692_vm0 = vmmov 0   ;;  %v693_v1 = vmov 0   ;;  %vm275_vm1 = vcmask 1043456   ;;  %p251_p7 = scmp.lt.s32.totalorder %s676_s16, 1 }
  0x38   : > { %512 = vmatprep.subr.mxu0 %v691_v0  ;;  %514 = vmatprep.mubr.msk.f32.mxu0 %vm692_vm0, %v691_v0  ;;  %vm271_vm2 = vcmask 31744   ;;  %v264_v2 = vld [vmem:[%s205_s27] sm:$0xf]  ;;  %p255_p10 = scmp.lt.s32.totalorder %s672_s15, 1 }
  0x39   : > { %591 = vset.pattern.permute.xlu0 %v693_v1  ;;  %v263_v3 = vld [vmem:[%s873_s1] sm:$0x7]  ;;  %513 = vmatpush3.msk.msra.mxu0 %vm275_vm1, %v264_v2  ;;  %s895_s16 = smov (!%p251_p7, %s676_s16), 1 }
  0x3a   : > { %v265_v4 = vld [vmem:[%s874_s2] sm:$0x7]  ;;  %515 = vmatmul.mubr.msk.f32.vlgmr.msra.gmra.mrb[0].mxu0 %vm271_vm2, %v263_v3  ;;  %s897_s15 = smov (!%p255_p10, %s672_s15), 1  ;;  %s504_s23 = sshll.u32 %s895_s16, 1 }
  0x3b   : > { %268 = vperm.xlu0 %591, %v265_v4   ;;  %s260_s25 = sadd.s32 %s504_s23, %s897_s15 }
  0x3c   : > { %s505_s28 = sshll.u32 %s260_s25, 2 }
  0x3d   : > { %s262_s29 = scalar_lea.vmem %s875_s3, %s505_s28 }
  0xba   : > { %v269_v5 = vpop.permute.xlu0 %268 }
 0x10d   : > { %v345_v6 = vpop.f32.mrb[0].mxu0 }
 0x10e   : > { %v346_v7 = vadd.f32 %v345_v6, %v269_v5  ;;  %v516_v8 = vpop.f32.mrb[1].mxu0 }
 0x110   : > { %349 = vst [vmem:[%s262_s29] sm:$0x7] %v346_v7 }
 0x111 PF: > { %s16_s19 = sadd.s32 1, %s688_s19   ;;  %s881_s12 = smov %s664_s13 }
 0x112   : > { %p13_p11 = scmp.ge.s32.totalorder %s16_s19, 6   ;;  %s882_s13 = smov %s668_s14 }
 0x113   : > { %s883_s14 = smov %s781_s5  ;;  %s884_s15 = smov %s680_s17 }
 0x114   : > { %s885_s16 = smov %s684_s18  ;;  %s886_s17 = smov %s889_s21 }
 0x115   : > { %s887_s18 = smov %s893_s22  ;;  %15 = sbr.rel (!%p13_p11) target bundleno = 5 (0x5), region = 78 }
 0x11c   :  { %385 = vsyncpa [#allocation3], 1 }
 0x11d   :  { %387 = vsyncpa [#allocation3 + $0x1], 1 }

</bundles_post_ra>
